<compile_context>
chip_gen: v7x
topology: tpu7x:2x2x1
jax: 0.10.0
libtpu: 0.0.40
codegen_flags: <defaults>
</compile_context>

<pallas_src>
import functools

import jax
import jax.numpy as jnp
import numpy as np
from jax import lax
from jax.experimental import pallas as pl
from jax.experimental.pallas import tpu as pltpu


# ---------------------------------------------------------------------------
# Host-side (numpy) fusion: densePool + Conv3d + view + 1x1 Conv2d -> affine map
# ---------------------------------------------------------------------------
def _pool_operator(n, shift, pad):
    """(n//2 + 2*pad, n): 2-wide / stride-2 average pool along one axis for the
    `shift` variant (replicate-edge clamp), with the Conv zero padding folded
    in as `pad` zero rows on each side."""
    no = n // 2
    m = np.zeros((no, n), np.float32)
    for i in range(no):
        m[i, min(2 * i + shift, n - 1)] += 0.5
        m[i, min(2 * i + 1 + shift, n - 1)] += 0.5
    return np.pad(m, ((pad, pad), (0, 0)))


def _build_fused_affine(w1, b1, w2, b2, C, H, W, ks, pad):
    """Returns (wfull, bias, Hc, Wc) such that
       out[b, o, h, w] = x[b].reshape(-1) @ wfull[:, (o*Hc + h)*Wc + w] + bias[o]."""
    w1 = np.asarray(w1, np.float32)
    b1 = np.asarray(b1, np.float32)
    w2 = np.asarray(w2, np.float32)
    b2 = np.asarray(b2, np.float32)
    O = w1.shape[0]
    kd = w1.shape[2]                       # Conv3d depth taps = 3
    Dd = 4 - kd + 1                        # Conv3d depth-out (4 shift variants, no depth pad) = 2
    Ho, Wo = H // 2, W // 2
    Hp, Wp = Ho + 2 * pad, Wo + 2 * pad
    Hc, Wc = Hp - ks + 1, Wp - ks + 1

    # 1x1 Conv2d weight regrouped: its input channel is o*Dd + d (from the .view)
    w2r = w2[:, :, 0, 0].reshape(O, O, Dd)                        # (p, o, d)

    # Effective per-shift-variant conv weight:
    #   Weff[p, c, g, kh, kw] = sum_{o,d,k} w2r[p,o,d] * w1[o,c,k,kh,kw] * [g == d + k]
    weff = np.zeros((O, C, 4, ks, ks), np.float32)
    for d in range(Dd):
        for k in range(kd):
            weff[:, :, d + k] += np.einsum('po,ocab->pcab', w2r[:, :, d], w1[:, :, k])
    bias_o = w2r.sum(axis=2) @ b1 + b2                            # fused bias, (O,)

    # Separable pooling operators (shift dh/dw in {0,1}) with the Conv spatial
    # zero padding folded in, then the (kh, kw) taps folded in as row windows.
    AH = np.stack([_pool_operator(H, s, pad) for s in (0, 1)])    # (2, Hp, H)
    AW = np.stack([_pool_operator(W, s, pad) for s in (0, 1)])    # (2, Wp, W)
    TH = np.stack([AH[:, k:k + Hc, :] for k in range(ks)], 1)     # (2, ks, Hc, H)
    TW = np.stack([AW[:, k:k + Wc, :] for k in range(ks)], 1)     # (2, ks, Wc, W)

    wg = weff.reshape(O, C, 2, 2, ks, ks)                         # g -> (dh, dw)
    # WFULL[(c,y,z),(p,h,w)] = sum_{dh,dw,kh,kw} wg[p,c,dh,dw,kh,kw]*TH[dh,kh,h,y]*TW[dw,kw,w,z]
    wfull = np.einsum('pcdeab,dahy,ebwz->cyzphw', wg, TH, TW, optimize=True)
    wfull = np.ascontiguousarray(wfull.reshape(C * H * W, O * Hc * Wc))
    bias = np.repeat(bias_o, Hc * Wc)                             # (O*Hc*Wc,)
    return wfull, bias, Hc, Wc


# ---------------------------------------------------------------------------
# Pallas kernel: one batch tile = one MXU matmul + bias add
# ---------------------------------------------------------------------------
def _aa3d_kernel(x_ref, w_ref, b_ref, o_ref):
    # x_ref: (TB, C*H*W)       bf16  TB flattened images (lane-dense, K mult of 128)
    # w_ref: (C*H*W, O*Hc*Wc)  bf16  fully fused affine weight (grid-constant)
    # b_ref: (1, O*Hc*Wc)      f32   fused bias row
    # o_ref: (TB, O*Hc*Wc)     f32   lane-dense output slab (N mult of 128)
    o_ref[...] = jnp.dot(x_ref[...], w_ref[...],
                         preferred_element_type=jnp.float32) + b_ref[...]


def make_aa3d_forward(w1, b1, w2, b2, *, in_channel, height, width,
                      kernel_size, padding, batch_tile=32):
    """Pre-fuses all weights on the host (once) and returns forward(x)."""
    ks, p = kernel_size, padding
    He, We = height + (height % 2), width + (width % 2)   # densePool even-pads odd dims
    C = in_channel
    O = int(np.asarray(w1).shape[0])

    wfull_np, bias_np, Hc, Wc = _build_fused_affine(w1, b1, w2, b2, C, He, We, ks, p)
    K, N = wfull_np.shape                                  # (C*He*We, O*Hc*Wc)
    wfull = jnp.asarray(wfull_np).astype(jnp.bfloat16)     # MXU operand, built once
    bias_row = jnp.asarray(bias_np, jnp.float32)[None, :]  # (1, N)

    def forward(x):
        B = x.shape[0]
        # densePool replicate-pads odd spatial dims first
        if x.shape[3] % 2 == 1:
            x = jnp.pad(x, ((0, 0), (0, 0), (0, 0), (0, 1)), mode="edge")
        if x.shape[2] % 2 == 1:
            x = jnp.pad(x, ((0, 0), (0, 0), (0, 1), (0, 0)), mode="edge")
        xf = x.reshape(B, K).astype(jnp.bfloat16)          # lane-dense rows (K = mult of 128)

        # Batch tile -> M rows of the fused matmul (review: TB=32 for v6e/v7x;
        # 16 already fills M=128 on v5e).  With the tiny demo batch (B=2) the
        # grid has a single step; real batches give >=2 steps per TensorCore.
        tb = min(batch_tile, B)
        bp = ((B + tb - 1) // tb) * tb
        if bp != B:
            xf = jnp.pad(xf, ((0, bp - B), (0, 0)))

        out = pl.pallas_call(
            _aa3d_kernel,
            out_shape=jax.ShapeDtypeStruct((bp, N), jnp.float32),
            grid=(bp // tb,),
            in_specs=[
                pl.BlockSpec((tb, K), lambda i: (i, 0)),
                pl.BlockSpec((K, N), lambda i: (0, 0)),    # grid-constant weight
                pl.BlockSpec((1, N), lambda i: (0, 0)),    # grid-constant bias
            ],
            out_specs=pl.BlockSpec((tb, N), lambda i: (i, 0)),
            compiler_params=pltpu.CompilerParams(
                dimension_semantics=("parallel",),         # megacore-shard batch tiles
                vmem_limit_bytes=32 * 1024 * 1024,         # ~2.5 MB used; safe on v7x's 64 MiB
            ),
        )(xf, wfull, bias_row)

        # (bp, O*Hc*Wc) -> (B, O, Hc, Wc)   (layout plumbing only)
        return out[:B].reshape(B, O, Hc, Wc)

    return forward


# ---------------------------------------------------------------------------
# Pure-JAX reference (mirrors the PyTorch module)
# ---------------------------------------------------------------------------
def _ref_densepool(x):
    if x.shape[3] % 2 == 1:
        x = jnp.pad(x, ((0, 0), (0, 0), (0, 0), (0, 1)), mode="edge")
    if x.shape[2] % 2 == 1:
        x = jnp.pad(x, ((0, 0), (0, 0), (0, 1), (0, 0)), mode="edge")

    def pool(v):
        return 0.25 * (v[:, :, 0::2, 0::2] + v[:, :, 0::2, 1::2]
                       + v[:, :, 1::2, 0::2] + v[:, :, 1::2, 1::2])

    sw = lambda v: jnp.concatenate([v[:, :, :, 1:], v[:, :, :, -1:]], axis=3)
    sh = lambda v: jnp.concatenate([v[:, :, 1:, :], v[:, :, -1:, :]], axis=2)
    return jnp.stack([pool(x), pool(sw(x)), pool(sh(x)), pool(sh(sw(x)))], axis=2)


def _ref_forward(x, w1, b1, w2, b2, padding):
    d3 = _ref_densepool(x)
    c1 = lax.conv_general_dilated(
        d3, w1, window_strides=(1, 1, 1),
        padding=((0, 0), (padding, padding), (padding, padding)),
        dimension_numbers=("NCDHW", "OIDHW", "NCDHW"),
        precision=lax.Precision.HIGHEST) + b1[None, :, None, None, None]
    B = x.shape[0]
    c2_in = c1.reshape(B, -1, c1.shape[3], c1.shape[4])
    out = lax.conv_general_dilated(
        c2_in, w2, window_strides=(1, 1), padding=((0, 0), (0, 0)),
        dimension_numbers=("NCHW", "OIHW", "NCHW"),
        precision=lax.Precision.HIGHEST) + b2[None, :, None, None]
    return out


# ---------------------------------------------------------------------------
if __name__ == "__main__":
    B, C_in, H, W = 2, 4, 16, 16          # input: (B, in_channel, H, W)
    O, ks, pad = 8, 3, 1                  # AA_3D(in_channel=4, out_channel=8, kernel_size=3, padding=1)

    key = jax.random.PRNGKey(0)
    k1, k2, k3, k4, kx = jax.random.split(key, 5)
    w1 = jax.random.normal(k1, (O, C_in, 3, ks, ks), jnp.float32) * 0.1  # Conv3d weight
    b1 = jax.random.normal(k2, (O,), jnp.float32) * 0.1                  # Conv3d bias
    w2 = jax.random.normal(k3, (O, 2 * O, 1, 1), jnp.float32) * 0.1      # Conv2d 1x1 weight
    b2 = jax.random.normal(k4, (O,), jnp.float32) * 0.1                  # Conv2d 1x1 bias
    x = jax.random.normal(kx, (B, C_in, H, W), jnp.float32)

    fwd = jax.jit(make_aa3d_forward(
        w1, b1, w2, b2, in_channel=C_in, height=H, width=W,
        kernel_size=ks, padding=pad))
    out = jax.block_until_ready(fwd(x))

    ref = jax.block_until_ready(_ref_forward(x, w1, b1, w2, b2, pad))
    assert out.shape == ref.shape == (B, O, H // 2 + 2 * pad - ks + 1, W // 2 + 2 * pad - ks + 1)
    np.testing.assert_allclose(np.asarray(out), np.asarray(ref), rtol=2e-2, atol=2e-2)

    print("KERNEL_OK")
</pallas_src>

<mosaic_0001>
module attributes {stable_mosaic.version = 11 : i64} {
  func.func @_aa3d_kernel(%arg0: i32, %arg1: memref<2x1024xbf16, #tpu.memory_space<vmem>>, %arg2: memref<1024x512xbf16, #tpu.memory_space<vmem>>, %arg3: memref<1x512xf32, #tpu.memory_space<vmem>>, %arg4: memref<2x512xf32, #tpu.memory_space<vmem>>) attributes {dimension_semantics = [#tpu.dimension_semantics<parallel>], iteration_bounds = array<i64: 1>, scalar_prefetch = 0 : i64, scratch_operands = 0 : i64, tpu.core_type = #tpu.core_type<tc>, window_params = [{transform_indices = @transform_0, window_bounds = array<i64: 2, 1024>}, {pipeline_mode = #tpu.pipeline_mode<synchronous>, transform_indices = @transform_1, window_bounds = array<i64: 1024, 512>}, {pipeline_mode = #tpu.pipeline_mode<synchronous>, transform_indices = @transform_2, window_bounds = array<i64: 1, 512>}, {transform_indices = @transform_3, window_bounds = array<i64: 2, 512>}]} {
    %c0 = arith.constant 0 : index
    %c0_0 = arith.constant 0 : index
    %0 = vector.load %arg1[%c0, %c0_0] : memref<2x1024xbf16, #tpu.memory_space<vmem>>, vector<2x1024xbf16>
    %c0_1 = arith.constant 0 : index
    %c0_2 = arith.constant 0 : index
    %1 = vector.load %arg2[%c0_1, %c0_2] : memref<1024x512xbf16, #tpu.memory_space<vmem>>, vector<1024x512xbf16>
    %cst = arith.constant dense<0.000000e+00> : vector<2x512xf32>
    %2 = tpu.matmul %0, %1, %cst {dimension_numbers = #tpu.dot_dimension_numbers<[1], [0], [0], [1], [0, 0, 1, 1], [], []>} : vector<2x1024xbf16>, vector<1024x512xbf16>, vector<2x512xf32> -> vector<2x512xf32>
    %c0_3 = arith.constant 0 : index
    %c0_4 = arith.constant 0 : index
    %3 = vector.load %arg3[%c0_3, %c0_4] : memref<1x512xf32, #tpu.memory_space<vmem>>, vector<1x512xf32>
    %4 = vector.broadcast %3 : vector<1x512xf32> to vector<2x512xf32>
    %5 = arith.addf %2, %4 : vector<2x512xf32>
    %c0_5 = arith.constant 0 : index
    %c0_6 = arith.constant 0 : index
    %6 = vector.load %arg4[%c0_5, %c0_6] : memref<2x512xf32, #tpu.memory_space<vmem>>, vector<2x512xf32>
    tpu.vector_store %arg4[%c0_5, %c0_6], %5 {strides = array<i32>} : memref<2x512xf32, #tpu.memory_space<vmem>>, vector<2x512xf32>,
    return
  }
  func.func @transform_0(%arg0: i32) -> (i32, i32) {
    %c0_i32 = arith.constant 0 : i32
    %c0_i32_0 = arith.constant 0 : i32
    return %arg0, %c0_i32 : i32, i32
  }
  func.func @transform_1(%arg0: i32) -> (i32, i32) {
    %c0_i32 = arith.constant 0 : i32
    %c0_i32_0 = arith.constant 0 : i32
    %c0_i32_1 = arith.constant 0 : i32
    return %c0_i32, %c0_i32_0 : i32, i32
  }
  func.func @transform_2(%arg0: i32) -> (i32, i32) {
    %c0_i32 = arith.constant 0 : i32
    %c0_i32_0 = arith.constant 0 : i32
    %c0_i32_1 = arith.constant 0 : i32
    return %c0_i32, %c0_i32_0 : i32, i32
  }
  func.func @transform_3(%arg0: i32) -> (i32, i32) {
    %c0_i32 = arith.constant 0 : i32
    %c0_i32_0 = arith.constant 0 : i32
    return %arg0, %c0_i32 : i32, i32
  }
}

</mosaic_0001>

<bundles_post_ra>
// kernel: forward.1
= control target key start
LH: loop header
LB: loop body
LE: loop exit
PB: predicated region body
PF: predicated region fallthrough
CT: control target
= control target key end

     0   :  { %v273_v36 = vlaneseq  ;;  %v2657_v37 = vmov 1966171168   ;;  %s3490_s1 = inlined_call_operand.vmem [shape: bf16[1024,512], index: 1, kind: input, shape index: {}]   ;;  %s3491_s0 = inlined_call_operand.vmem [shape: bf16[2,1024], index: 0, kind: input, shape index: {}]   ;;  %s3492_s2 = inlined_call_operand.vmem [shape: f32[1,512], index: 2, kind: input, shape index: {}]   ;;  %s3493_s3 = inlined_call_operand.vmem [shape: f32[2,512], index: 3, kind: output, shape index: {}]  }
   0x1   :  { %v2272_v0 = vld [vmem:[%s3490_s1 + $0x4] ss:$16 sps:$4 sm:$0xff]   ;;  %v2274_v1 = vld [vmem:[%s3490_s1 + $0xc] ss:$16 sps:$4 sm:$0xff]   ;;  %v2276_v2 = vld [vmem:[%s3490_s1] ss:$16 sps:$4 sm:$0xff]   ;;  %v296_v38 = vunpack.c.l.s4 %v2657_v37 }
   0x2   :  { %1631 = vmatprep.subr.bf16.mxu0 %v2272_v0  ;;  %v2277_v3 = vld [vmem:[%s3490_s1 + $0x8] ss:$16 sps:$4 sm:$0xff]   ;;  %1795 = vmatprep.subr.bf16.mxu1 %v2274_v1  ;;  %v2278_v4 = vld [vmem:[%s3490_s1 + $0x24] ss:$16 sps:$4 sm:$0xff]   ;;  %v2280_v5 = vld [vmem:[%s3490_s1 + $0x2c] ss:$16 sps:$4 sm:$0xff]  }
   0x3   :  { %1632 = vmatpush1.bf16.msra.mxu0 %v2276_v2  ;;  %1796 = vmatpush1.bf16.msra.mxu1 %v2277_v3  ;;  %v2282_v6 = vld [vmem:[%s3490_s1 + $0x20] ss:$16 sps:$4 sm:$0xff]   ;;  %v2283_v7 = vld [vmem:[%s3490_s1 + $0x28] ss:$16 sps:$4 sm:$0xff]   ;;  %v2284_v8 = vld [vmem:[%s3490_s1 + $0x44] ss:$16 sps:$4 sm:$0xff]   ;;  %v297_v43 = vunpack.c.0.s8 %v296_v38 }
   0x4   :  { %1633 = vmatprep.subr.bf16.mxu0 %v2278_v4  ;;  %1797 = vmatprep.subr.bf16.mxu1 %v2280_v5  ;;  %v2286_v9 = vld [vmem:[%s3490_s1 + $0x4c] ss:$16 sps:$4 sm:$0xff]   ;;  %v2288_v10 = vld [vmem:[%s3490_s1 + $0x40] ss:$16 sps:$4 sm:$0xff]   ;;  %v2289_v11 = vld [vmem:[%s3490_s1 + $0x48] ss:$16 sps:$4 sm:$0xff]  }
   0x5   :  { %v2290_v12 = vld [vmem:[%s3490_s1 + $0x64] ss:$16 sps:$4 sm:$0xff]   ;;  %v2292_v13 = vld [vmem:[%s3490_s1 + $0x6c] ss:$16 sps:$4 sm:$0xff]   ;;  %v2294_v14 = vld [vmem:[%s3490_s1 + $0x60] ss:$16 sps:$4 sm:$0xff]  }
   0x6   :  { %v2295_v15 = vld [vmem:[%s3490_s1 + $0x68] ss:$16 sps:$4 sm:$0xff]   ;;  %v2296_v16 = vld [vmem:[%s3490_s1 + $0x84] ss:$16 sps:$4 sm:$0xff]   ;;  %v2298_v17 = vld [vmem:[%s3490_s1 + $0x8c] ss:$16 sps:$4 sm:$0xff]  }
   0x7   :  { %1634 = vmatpush1.bf16.msra.mxu0 %v2282_v6  ;;  %1798 = vmatpush1.bf16.msra.mxu1 %v2283_v7  ;;  %v2300_v18 = vld [vmem:[%s3490_s1 + $0x80] ss:$16 sps:$4 sm:$0xff]   ;;  %v2301_v19 = vld [vmem:[%s3490_s1 + $0x88] ss:$16 sps:$4 sm:$0xff]   ;;  %v2302_v20 = vld [vmem:[%s3490_s1 + $0xa4] ss:$16 sps:$4 sm:$0xff]  }
   0x8   :  { %1635 = vmatprep.subr.bf16.mxu0 %v2284_v8  ;;  %1799 = vmatprep.subr.bf16.mxu1 %v2286_v9  ;;  %v2304_v21 = vld [vmem:[%s3490_s1 + $0xac] ss:$16 sps:$4 sm:$0xff]   ;;  %v2306_v22 = vld [vmem:[%s3490_s1 + $0xa0] ss:$16 sps:$4 sm:$0xff]   ;;  %v2307_v23 = vld [vmem:[%s3490_s1 + $0xa8] ss:$16 sps:$4 sm:$0xff]  }
   0x9   :  { %v2308_v24 = vld [vmem:[%s3490_s1 + $0xc4] ss:$16 sps:$4 sm:$0xff]   ;;  %v2310_v25 = vld [vmem:[%s3490_s1 + $0xcc] ss:$16 sps:$4 sm:$0xff]   ;;  %v2312_v26 = vld [vmem:[%s3490_s1 + $0xc0] ss:$16 sps:$4 sm:$0xff]  }
   0xa   :  { %v2313_v27 = vld [vmem:[%s3490_s1 + $0xc8] ss:$16 sps:$4 sm:$0xff]   ;;  %v2314_v28 = vld [vmem:[%s3490_s1 + $0xe4] ss:$16 sps:$4 sm:$0xff]   ;;  %v2316_v29 = vld [vmem:[%s3490_s1 + $0xec] ss:$16 sps:$4 sm:$0xff]  }
   0xb   :  { %1636 = vmatpush1.bf16.msra.mxu0 %v2288_v10  ;;  %1800 = vmatpush1.bf16.msra.mxu1 %v2289_v11  ;;  %v2318_v30 = vld [vmem:[%s3490_s1 + $0xe0] ss:$16 sps:$4 sm:$0xff]   ;;  %v2319_v31 = vld [vmem:[%s3490_s1 + $0xe8] ss:$16 sps:$4 sm:$0xff]   ;;  %v2320_v32 = vld [vmem:[%s3490_s1 + $0x104] ss:$16 sps:$4 sm:$0xff]  }
   0xc   :  { %1637 = vmatprep.subr.bf16.mxu0 %v2290_v12  ;;  %1801 = vmatprep.subr.bf16.mxu1 %v2292_v13  ;;  %v2322_v33 = vld [vmem:[%s3490_s1 + $0x10c] ss:$16 sps:$4 sm:$0xff]   ;;  %v2324_v34 = vld [vmem:[%s3490_s1 + $0x100] ss:$16 sps:$4 sm:$0xff]   ;;  %v2325_v35 = vld [vmem:[%s3490_s1 + $0x108] ss:$16 sps:$4 sm:$0xff]  }
   0xd   :  { %v2326_v39 = vld [vmem:[%s3490_s1 + $0x124] ss:$16 sps:$4 sm:$0xff]   ;;  %v2328_v40 = vld [vmem:[%s3490_s1 + $0x12c] ss:$16 sps:$4 sm:$0xff]   ;;  %v2330_v41 = vld [vmem:[%s3490_s1 + $0x120] ss:$16 sps:$4 sm:$0xff]  }
   0xe   :  { %v2796_v42 = vshrl.u32 %v273_v36, 7  ;;  %v2331_v44 = vld [vmem:[%s3490_s1 + $0x128] ss:$16 sps:$4 sm:$0xff]   ;;  %v2332_v45 = vld [vmem:[%s3490_s1 + $0x144] ss:$16 sps:$4 sm:$0xff]  }
   0xf   :  { %1638 = vmatpush1.bf16.msra.mxu0 %v2294_v14  ;;  %1802 = vmatpush1.bf16.msra.mxu1 %v2295_v15  ;;  %v2334_v46 = vld [vmem:[%s3490_s1 + $0x14c] ss:$16 sps:$4 sm:$0xff]   ;;  %v2336_v47 = vld [vmem:[%s3490_s1 + $0x140] ss:$16 sps:$4 sm:$0xff]   ;;  %v2337_v48 = vld [vmem:[%s3490_s1 + $0x148] ss:$16 sps:$4 sm:$0xff]  }
  0x10   :  { %1639 = vmatprep.subr.bf16.mxu0 %v2296_v16  ;;  %1803 = vmatprep.subr.bf16.mxu1 %v2298_v17  ;;  %v2814_v49 = vsub.s32 %v297_v43, %v2796_v42  ;;  %v2338_v50 = vld [vmem:[%s3490_s1 + $0x164] ss:$16 sps:$4 sm:$0xff]   ;;  %v2340_v51 = vld [vmem:[%s3490_s1 + $0x16c] ss:$16 sps:$4 sm:$0xff]   ;;  %v2342_v53 = vld [vmem:[%s3490_s1 + $0x160] ss:$16 sps:$4 sm:$0xff]  }
  0x11   :  { %v14_v52 = vld [vmem:[%s3491_s0] sm:$0xff]  ;;  %v2343_v55 = vld [vmem:[%s3490_s1 + $0x168] ss:$16 sps:$4 sm:$0xff]   ;;  %v2346_v57 = vld [vmem:[%s3490_s1 + $0x18c] ss:$16 sps:$4 sm:$0xff]  }
  0x12   :  { %v301_v54 = vrot.slane %v14_v52, %v2814_v49  ;;  %v2344_v56 = vld [vmem:[%s3490_s1 + $0x184] ss:$16 sps:$4 sm:$0xff]   ;;  %v2348_v59 = vld [vmem:[%s3490_s1 + $0x180] ss:$16 sps:$4 sm:$0xff]   ;;  %v2349_v61 = vld [vmem:[%s3490_s1 + $0x188] ss:$16 sps:$4 sm:$0xff]   ;;  %v294_v9 = vcombine.high %v14_v52, %v14_v52 }
  0x13   :  { %1640 = vmatpush1.bf16.msra.mxu0 %v2300_v18  ;;  %1804 = vmatpush1.bf16.msra.mxu1 %v2301_v19  ;;  %v2350_v62 = vld [vmem:[%s3490_s1 + $0x1a4] ss:$16 sps:$4 sm:$0xff]   ;;  %v2352_v63 = vld [vmem:[%s3490_s1 + $0x1ac] ss:$16 sps:$4 sm:$0xff]   ;;  %v2354_v0 = vld [vmem:[%s3490_s1 + $0x1a0] ss:$16 sps:$4 sm:$0xff]  }
  0x14   :  { %1641 = vmatprep.subr.bf16.mxu0 %v2302_v20  ;;  %1805 = vmatprep.subr.bf16.mxu1 %v2304_v21  ;;  %v309_v58 = vcombine.high %v301_v54, %v301_v54  ;;  %v2355_v1 = vld [vmem:[%s3490_s1 + $0x1a8] ss:$16 sps:$4 sm:$0xff]   ;;  %v2356_v2 = vld [vmem:[%s3490_s1 + $0x1c4] ss:$16 sps:$4 sm:$0xff]   ;;  %v2358_v3 = vld [vmem:[%s3490_s1 + $0x1cc] ss:$16 sps:$4 sm:$0xff]   ;;  %v308_v13 = vrot.slane %v294_v9, %v2814_v49  ;;  %v2892_v15 = vrot.slane %v301_v54, %v2814_v49 }
  0x15   :  { %v2360_v4 = vld [vmem:[%s3490_s1 + $0x1c0] ss:$16 sps:$4 sm:$0xff]   ;;  %v2361_v5 = vld [vmem:[%s3490_s1 + $0x1c8] ss:$16 sps:$4 sm:$0xff]   ;;  %v2362_v6 = vld [vmem:[%s3490_s1 + $0x1e4] ss:$16 sps:$4 sm:$0xff]  }
  0x16   :  { %v331_v60 = vrot.slane %v309_v58, %v2814_v49  ;;  %v2364_v7 = vld [vmem:[%s3490_s1 + $0x1ec] ss:$16 sps:$4 sm:$0xff]   ;;  %v2366_v8 = vld [vmem:[%s3490_s1 + $0x1e0] ss:$16 sps:$4 sm:$0xff]   ;;  %v2367_v10 = vld [vmem:[%s3490_s1 + $0x1e8] ss:$16 sps:$4 sm:$0xff]   ;;  %v310_v16 = vcombine.high %v308_v13, %v308_v13  ;;  %v2907_v21 = vrot.slane %v308_v13, %v2814_v49 }
  0x17   :  { %1642 = vmatpush1.bf16.msra.mxu0 %v2306_v22  ;;  %1806 = vmatpush1.bf16.msra.mxu1 %v2307_v23  ;;  %v2370_v11 = vld [vmem:[%s3490_s1 + $0x204] ss:$16 sps:$4 sm:$0xff]   ;;  %v2373_v12 = vld [vmem:[%s3490_s1 + $0x20c] ss:$16 sps:$4 sm:$0xff]   ;;  %v2368_v14 = vld [vmem:[%s3490_s1 + $0x200] ss:$16 sps:$4 sm:$0xff]  }
  0x18   :  { %1643 = vmatprep.subr.bf16.mxu0 %v2308_v24  ;;  %1807 = vmatprep.subr.bf16.mxu1 %v2310_v25  ;;  %v2371_v17 = vld [vmem:[%s3490_s1 + $0x208] ss:$16 sps:$4 sm:$0xff]   ;;  %v2376_v18 = vld [vmem:[%s3490_s1 + $0x224] ss:$16 sps:$4 sm:$0xff]   ;;  %v2379_v19 = vld [vmem:[%s3490_s1 + $0x22c] ss:$16 sps:$4 sm:$0xff]   ;;  %v2904_v20 = vrot.slane %v310_v16, %v2814_v49  ;;  %v341_v22 = vcombine.high %v331_v60, %v331_v60 }
  0x19   :  { %1663 = vmatprep.mubr.bf16.mxu0 %v331_v60  ;;  %1827 = vmatprep.mubr.bf16.mxu1 %v331_v60  ;;  %v2374_v23 = vld [vmem:[%s3490_s1 + $0x220] ss:$16 sps:$4 sm:$0xff]   ;;  %v2377_v24 = vld [vmem:[%s3490_s1 + $0x228] ss:$16 sps:$4 sm:$0xff]   ;;  %v2382_v25 = vld [vmem:[%s3490_s1 + $0x244] ss:$16 sps:$4 sm:$0xff]  }
  0x1a   :  { %v2395_v36 = vld [vmem:[%s3490_s1 + $0x288] ss:$16 sps:$4 sm:$0xff]   ;;  %v2400_v37 = vld [vmem:[%s3490_s1 + $0x2a4] ss:$16 sps:$4 sm:$0xff]   ;;  %v2403_v38 = vld [vmem:[%s3490_s1 + $0x2ac] ss:$16 sps:$4 sm:$0xff]  }
  0x1b   :  { %1644 = vmatpush1.bf16.msra.mxu0 %v2312_v26  ;;  %1808 = vmatpush1.bf16.msra.mxu1 %v2313_v27  ;;  %v2385_v26 = vld [vmem:[%s3490_s1 + $0x24c] ss:$16 sps:$4 sm:$0xff]   ;;  %v2380_v27 = vld [vmem:[%s3490_s1 + $0x240] ss:$16 sps:$4 sm:$0xff]   ;;  %v2413_v49 = vld [vmem:[%s3490_s1 + $0x2e8] ss:$16 sps:$4 sm:$0xff]  }
  0x1c   :  { %1645 = vmatprep.subr.bf16.mxu0 %v2314_v28  ;;  %1809 = vmatprep.subr.bf16.mxu1 %v2316_v29  ;;  %v2383_v28 = vld [vmem:[%s3490_s1 + $0x248] ss:$16 sps:$4 sm:$0xff]   ;;  %v2388_v29 = vld [vmem:[%s3490_s1 + $0x264] ss:$16 sps:$4 sm:$0xff]   ;;  %v2409_v43 = vld [vmem:[%s3490_s1 + $0x2cc] ss:$16 sps:$4 sm:$0xff]  }
  0x1d   :  { %v2416_v52 = vld [vmem:[%s3490_s1 + $0x300] ss:$16 sps:$4 sm:$0xff]   ;;  %v2424_v54 = vld [vmem:[%s3490_s1 + $0x324] ss:$16 sps:$4 sm:$0xff]   ;;  %v2449_v9 = vld [vmem:[%s3490_s1 + $0x3a8] ss:$16 sps:$4 sm:$0xff]  }
  0x1e   :  { %v2430_v58 = vld [vmem:[%s3490_s1 + $0x344] ss:$16 sps:$4 sm:$0xff]   ;;  %v2428_v60 = vld [vmem:[%s3490_s1 + $0x340] ss:$16 sps:$4 sm:$0xff]   ;;  %v2455_v13 = vld [vmem:[%s3490_s1 + $0x3c8] ss:$16 sps:$4 sm:$0xff]  }
  0x1f   :  { %1646 = vmatpush1.bf16.msra.mxu0 %v2318_v30  ;;  %1810 = vmatpush1.bf16.msra.mxu1 %v2319_v31  ;;  %v2391_v30 = vld [vmem:[%s3490_s1 + $0x26c] ss:$16 sps:$4 sm:$0xff]   ;;  %v2386_v31 = vld [vmem:[%s3490_s1 + $0x260] ss:$16 sps:$4 sm:$0xff]  }
  0x20   :  { %1647 = vmatprep.subr.bf16.mxu0 %v2320_v32  ;;  %1811 = vmatprep.subr.bf16.mxu1 %v2322_v33  ;;  %v2389_v32 = vld [vmem:[%s3490_s1 + $0x268] ss:$16 sps:$4 sm:$0xff]   ;;  %v2394_v33 = vld [vmem:[%s3490_s1 + $0x284] ss:$16 sps:$4 sm:$0xff]   ;;  %v2463_v16 = vld [vmem:[%s3490_s1 + $0x3ec] ss:$16 sps:$4 sm:$0xff]  }
  0x23   :  { %1648 = vmatpush1.bf16.msra.mxu0 %v2324_v34  ;;  %1812 = vmatpush1.bf16.msra.mxu1 %v2325_v35  ;;  %v2397_v34 = vld [vmem:[%s3490_s1 + $0x28c] ss:$16 sps:$4 sm:$0xff]   ;;  %v2392_v35 = vld [vmem:[%s3490_s1 + $0x280] ss:$16 sps:$4 sm:$0xff]  }
  0x24   :  { %1649 = vmatprep.subr.bf16.mxu0 %v2326_v39  ;;  %1813 = vmatprep.subr.bf16.mxu1 %v2328_v40  ;;  %v2398_v39 = vld [vmem:[%s3490_s1 + $0x2a0] ss:$16 sps:$4 sm:$0xff]   ;;  %v2401_v40 = vld [vmem:[%s3490_s1 + $0x2a8] ss:$16 sps:$4 sm:$0xff]  }
  0x27   :  { %1650 = vmatpush1.bf16.msra.mxu0 %v2330_v41  ;;  %1814 = vmatpush1.bf16.msra.mxu1 %v2331_v44  ;;  %v2406_v41 = vld [vmem:[%s3490_s1 + $0x2c4] ss:$16 sps:$4 sm:$0xff]   ;;  %v2404_v44 = vld [vmem:[%s3490_s1 + $0x2c0] ss:$16 sps:$4 sm:$0xff]  }
  0x28   :  { %1651 = vmatprep.subr.bf16.mxu0 %v2332_v45  ;;  %1815 = vmatprep.subr.bf16.mxu1 %v2334_v46  ;;  %v2407_v45 = vld [vmem:[%s3490_s1 + $0x2c8] ss:$16 sps:$4 sm:$0xff]   ;;  %v2412_v46 = vld [vmem:[%s3490_s1 + $0x2e4] ss:$16 sps:$4 sm:$0xff]  }
  0x2b   :  { %1652 = vmatpush1.bf16.msra.mxu0 %v2336_v47  ;;  %1816 = vmatpush1.bf16.msra.mxu1 %v2337_v48  ;;  %v2415_v47 = vld [vmem:[%s3490_s1 + $0x2ec] ss:$16 sps:$4 sm:$0xff]   ;;  %v2410_v48 = vld [vmem:[%s3490_s1 + $0x2e0] ss:$16 sps:$4 sm:$0xff]  }
  0x2c   :  { %1653 = vmatprep.subr.bf16.mxu0 %v2338_v50  ;;  %1817 = vmatprep.subr.bf16.mxu1 %v2340_v51  ;;  %v2418_v50 = vld [vmem:[%s3490_s1 + $0x304] ss:$16 sps:$4 sm:$0xff]   ;;  %v2421_v51 = vld [vmem:[%s3490_s1 + $0x30c] ss:$16 sps:$4 sm:$0xff]  }
  0x2f   :  { %1654 = vmatpush1.bf16.msra.mxu0 %v2342_v53  ;;  %1818 = vmatpush1.bf16.msra.mxu1 %v2343_v55  ;;  %v2419_v53 = vld [vmem:[%s3490_s1 + $0x308] ss:$16 sps:$4 sm:$0xff]   ;;  %v2427_v55 = vld [vmem:[%s3490_s1 + $0x32c] ss:$16 sps:$4 sm:$0xff]  }
  0x30   :  { %1655 = vmatprep.subr.bf16.mxu0 %v2344_v56  ;;  %1819 = vmatprep.subr.bf16.mxu1 %v2346_v57  ;;  %v2422_v56 = vld [vmem:[%s3490_s1 + $0x320] ss:$16 sps:$4 sm:$0xff]   ;;  %v2425_v57 = vld [vmem:[%s3490_s1 + $0x328] ss:$16 sps:$4 sm:$0xff]  }
  0x33   :  { %1656 = vmatpush1.bf16.msra.mxu0 %v2348_v59  ;;  %1820 = vmatpush1.bf16.msra.mxu1 %v2349_v61  ;;  %v2433_v59 = vld [vmem:[%s3490_s1 + $0x34c] ss:$16 sps:$4 sm:$0xff]   ;;  %v2431_v61 = vld [vmem:[%s3490_s1 + $0x348] ss:$16 sps:$4 sm:$0xff]  }
  0x34   :  { %1657 = vmatprep.subr.bf16.mxu0 %v2350_v62  ;;  %1821 = vmatprep.subr.bf16.mxu1 %v2352_v63  ;;  %v2436_v62 = vld [vmem:[%s3490_s1 + $0x364] ss:$16 sps:$4 sm:$0xff]   ;;  %v2439_v63 = vld [vmem:[%s3490_s1 + $0x36c] ss:$16 sps:$4 sm:$0xff]  }
  0x37   :  { %1658 = vmatpush1.bf16.msra.mxu0 %v2354_v0  ;;  %1822 = vmatpush1.bf16.msra.mxu1 %v2355_v1  ;;  %v2434_v0 = vld [vmem:[%s3490_s1 + $0x360] ss:$16 sps:$4 sm:$0xff]   ;;  %v2437_v1 = vld [vmem:[%s3490_s1 + $0x368] ss:$16 sps:$4 sm:$0xff]  }
  0x38   :  { %1659 = vmatprep.subr.bf16.mxu0 %v2356_v2  ;;  %1823 = vmatprep.subr.bf16.mxu1 %v2358_v3  ;;  %v2442_v2 = vld [vmem:[%s3490_s1 + $0x384] ss:$16 sps:$4 sm:$0xff]   ;;  %v2445_v3 = vld [vmem:[%s3490_s1 + $0x38c] ss:$16 sps:$4 sm:$0xff]  }
  0x3b   :  { %1660 = vmatpush1.bf16.msra.mxu0 %v2360_v4  ;;  %1824 = vmatpush1.bf16.msra.mxu1 %v2361_v5  ;;  %v2440_v4 = vld [vmem:[%s3490_s1 + $0x380] ss:$16 sps:$4 sm:$0xff]   ;;  %v2443_v5 = vld [vmem:[%s3490_s1 + $0x388] ss:$16 sps:$4 sm:$0xff]  }
  0x3c   :  { %1661 = vmatprep.subr.bf16.mxu0 %v2362_v6  ;;  %1825 = vmatprep.subr.bf16.mxu1 %v2364_v7  ;;  %v2448_v6 = vld [vmem:[%s3490_s1 + $0x3a4] ss:$16 sps:$4 sm:$0xff]   ;;  %v2451_v7 = vld [vmem:[%s3490_s1 + $0x3ac] ss:$16 sps:$4 sm:$0xff]  }
  0x3f   :  { %1662 = vmatpush1.bf16.msra.mxu0 %v2366_v8  ;;  %1826 = vmatpush1.bf16.msra.mxu1 %v2367_v10  ;;  %v2446_v8 = vld [vmem:[%s3490_s1 + $0x3a0] ss:$16 sps:$4 sm:$0xff]   ;;  %v2454_v10 = vld [vmem:[%s3490_s1 + $0x3c4] ss:$16 sps:$4 sm:$0xff]  }
  0x40   :  { %1672 = vmatprep.subr.bf16.mxu0 %v2370_v11  ;;  %1836 = vmatprep.subr.bf16.mxu1 %v2373_v12  ;;  %v2457_v11 = vld [vmem:[%s3490_s1 + $0x3cc] ss:$16 sps:$4 sm:$0xff]   ;;  %v2452_v12 = vld [vmem:[%s3490_s1 + $0x3c0] ss:$16 sps:$4 sm:$0xff]  }
  0x42   :  { %1664 = vmatmul.mubr.bf16.vlgmr.msra.gmra.mrb[0].mxu0 %v2892_v15  ;;  %1828 = vmatmul.mubr.bf16.vlgmr.msra.gmra.mrb[0].mxu1 %v2892_v15 }
  0x43   :  { %1673 = vmatpush1.bf16.msra.mxu0 %v2368_v14  ;;  %1837 = vmatpush1.bf16.msra.mxu1 %v2371_v17  ;;  %v2460_v14 = vld [vmem:[%s3490_s1 + $0x3e4] ss:$16 sps:$4 sm:$0xff]   ;;  %v2458_v17 = vld [vmem:[%s3490_s1 + $0x3e0] ss:$16 sps:$4 sm:$0xff]  }
  0x44   :  { %1674 = vmatprep.subr.bf16.mxu0 %v2376_v18  ;;  %1838 = vmatprep.subr.bf16.mxu1 %v2379_v19  ;;  %v2461_v18 = vld [vmem:[%s3490_s1 + $0x3e8] ss:$16 sps:$4 sm:$0xff]   ;;  %v2466_v19 = vld [vmem:[%s3490_s1 + $0x404] ss:$16 sps:$4 sm:$0xff]  }
  0x45   :  { %1704 = vmatprep.mubr.bf16.mxu0 %v341_v22  ;;  %1868 = vmatprep.mubr.bf16.mxu1 %v341_v22  ;;  %v2469_v22 = vld [vmem:[%s3490_s1 + $0x40c] ss:$16 sps:$4 sm:$0xff]  }
  0x47   :  { %1675 = vmatpush1.bf16.msra.mxu0 %v2374_v23  ;;  %1839 = vmatpush1.bf16.msra.mxu1 %v2377_v24  ;;  %v2464_v23 = vld [vmem:[%s3490_s1 + $0x400] ss:$16 sps:$4 sm:$0xff]   ;;  %v339_v24 = vcombine.high %v2892_v15, %v2892_v15 }
  0x48   :  { %1676 = vmatprep.subr.bf16.mxu0 %v2382_v25  ;;  %1840 = vmatprep.subr.bf16.mxu1 %v2385_v26  ;;  %v2467_v25 = vld [vmem:[%s3490_s1 + $0x408] ss:$16 sps:$4 sm:$0xff]   ;;  %v2472_v26 = vld [vmem:[%s3490_s1 + $0x424] ss:$16 sps:$4 sm:$0xff]   ;;  %v2470_v15 = vld [vmem:[%s3490_s1 + $0x420] ss:$16 sps:$4 sm:$0xff]  }
  0x4b   :  { %1677 = vmatpush1.bf16.msra.mxu0 %v2380_v27  ;;  %1841 = vmatpush1.bf16.msra.mxu1 %v2383_v28  ;;  %v2475_v27 = vld [vmem:[%s3490_s1 + $0x42c] ss:$16 sps:$4 sm:$0xff]   ;;  %v2473_v28 = vld [vmem:[%s3490_s1 + $0x428] ss:$16 sps:$4 sm:$0xff]  }
  0x4c   :  { %1678 = vmatprep.subr.bf16.mxu0 %v2388_v29  ;;  %1842 = vmatprep.subr.bf16.mxu1 %v2391_v30  ;;  %v2478_v29 = vld [vmem:[%s3490_s1 + $0x444] ss:$16 sps:$4 sm:$0xff]   ;;  %v2481_v30 = vld [vmem:[%s3490_s1 + $0x44c] ss:$16 sps:$4 sm:$0xff]  }
  0x4f   :  { %1679 = vmatpush1.bf16.msra.mxu0 %v2386_v31  ;;  %1843 = vmatpush1.bf16.msra.mxu1 %v2389_v32  ;;  %v2476_v31 = vld [vmem:[%s3490_s1 + $0x440] ss:$16 sps:$4 sm:$0xff]   ;;  %v2479_v32 = vld [vmem:[%s3490_s1 + $0x448] ss:$16 sps:$4 sm:$0xff]  }
  0x50   :  { %1680 = vmatprep.subr.bf16.mxu0 %v2394_v33  ;;  %1844 = vmatprep.subr.bf16.mxu1 %v2397_v34  ;;  %v2484_v33 = vld [vmem:[%s3490_s1 + $0x464] ss:$16 sps:$4 sm:$0xff]   ;;  %v2487_v34 = vld [vmem:[%s3490_s1 + $0x46c] ss:$16 sps:$4 sm:$0xff]  }
  0x53   :  { %1681 = vmatpush1.bf16.msra.mxu0 %v2392_v35  ;;  %1845 = vmatpush1.bf16.msra.mxu1 %v2395_v36  ;;  %v2482_v35 = vld [vmem:[%s3490_s1 + $0x460] ss:$16 sps:$4 sm:$0xff]   ;;  %v2485_v36 = vld [vmem:[%s3490_s1 + $0x468] ss:$16 sps:$4 sm:$0xff]  }
  0x54   :  { %1682 = vmatprep.subr.bf16.mxu0 %v2400_v37  ;;  %1846 = vmatprep.subr.bf16.mxu1 %v2403_v38  ;;  %v2490_v37 = vld [vmem:[%s3490_s1 + $0x484] ss:$16 sps:$4 sm:$0xff]   ;;  %v2493_v38 = vld [vmem:[%s3490_s1 + $0x48c] ss:$16 sps:$4 sm:$0xff]  }
  0x57   :  { %1683 = vmatpush1.bf16.msra.mxu0 %v2398_v39  ;;  %1847 = vmatpush1.bf16.msra.mxu1 %v2401_v40  ;;  %v2488_v39 = vld [vmem:[%s3490_s1 + $0x480] ss:$16 sps:$4 sm:$0xff]   ;;  %v2491_v40 = vld [vmem:[%s3490_s1 + $0x488] ss:$16 sps:$4 sm:$0xff]  }
  0x58   :  { %1684 = vmatprep.subr.bf16.mxu0 %v2406_v41  ;;  %1848 = vmatprep.subr.bf16.mxu1 %v2409_v43  ;;  %v2496_v41 = vld [vmem:[%s3490_s1 + $0x4a4] ss:$16 sps:$4 sm:$0xff]   ;;  %v2499_v43 = vld [vmem:[%s3490_s1 + $0x4ac] ss:$16 sps:$4 sm:$0xff]  }
  0x5b   :  { %1685 = vmatpush1.bf16.msra.mxu0 %v2404_v44  ;;  %1849 = vmatpush1.bf16.msra.mxu1 %v2407_v45  ;;  %v2494_v44 = vld [vmem:[%s3490_s1 + $0x4a0] ss:$16 sps:$4 sm:$0xff]   ;;  %v2497_v45 = vld [vmem:[%s3490_s1 + $0x4a8] ss:$16 sps:$4 sm:$0xff]  }
  0x5c   :  { %1686 = vmatprep.subr.bf16.mxu0 %v2412_v46  ;;  %1850 = vmatprep.subr.bf16.mxu1 %v2415_v47  ;;  %v2502_v46 = vld [vmem:[%s3490_s1 + $0x4c4] ss:$16 sps:$4 sm:$0xff]   ;;  %v2505_v47 = vld [vmem:[%s3490_s1 + $0x4cc] ss:$16 sps:$4 sm:$0xff]  }
  0x5f   :  { %1687 = vmatpush1.bf16.msra.mxu0 %v2410_v48  ;;  %1851 = vmatpush1.bf16.msra.mxu1 %v2413_v49  ;;  %v2500_v48 = vld [vmem:[%s3490_s1 + $0x4c0] ss:$16 sps:$4 sm:$0xff]   ;;  %v2503_v49 = vld [vmem:[%s3490_s1 + $0x4c8] ss:$16 sps:$4 sm:$0xff]  }
  0x60   :  { %1688 = vmatprep.subr.bf16.mxu0 %v2418_v50  ;;  %1852 = vmatprep.subr.bf16.mxu1 %v2421_v51  ;;  %v2508_v50 = vld [vmem:[%s3490_s1 + $0x4e4] ss:$16 sps:$4 sm:$0xff]   ;;  %v2511_v51 = vld [vmem:[%s3490_s1 + $0x4ec] ss:$16 sps:$4 sm:$0xff]  }
  0x63   :  { %1689 = vmatpush1.bf16.msra.mxu0 %v2416_v52  ;;  %1853 = vmatpush1.bf16.msra.mxu1 %v2419_v53  ;;  %v2506_v52 = vld [vmem:[%s3490_s1 + $0x4e0] ss:$16 sps:$4 sm:$0xff]   ;;  %v2509_v53 = vld [vmem:[%s3490_s1 + $0x4e8] ss:$16 sps:$4 sm:$0xff]  }
  0x64   :  { %1690 = vmatprep.subr.bf16.mxu0 %v2424_v54  ;;  %1854 = vmatprep.subr.bf16.mxu1 %v2427_v55  ;;  %v2514_v54 = vld [vmem:[%s3490_s1 + $0x504] ss:$16 sps:$4 sm:$0xff]   ;;  %v2517_v55 = vld [vmem:[%s3490_s1 + $0x50c] ss:$16 sps:$4 sm:$0xff]  }
  0x67   :  { %1691 = vmatpush1.bf16.msra.mxu0 %v2422_v56  ;;  %1855 = vmatpush1.bf16.msra.mxu1 %v2425_v57  ;;  %v2512_v56 = vld [vmem:[%s3490_s1 + $0x500] ss:$16 sps:$4 sm:$0xff]   ;;  %v2515_v57 = vld [vmem:[%s3490_s1 + $0x508] ss:$16 sps:$4 sm:$0xff]  }
  0x68   :  { %1692 = vmatprep.subr.bf16.mxu0 %v2430_v58  ;;  %1856 = vmatprep.subr.bf16.mxu1 %v2433_v59  ;;  %v2520_v58 = vld [vmem:[%s3490_s1 + $0x524] ss:$16 sps:$4 sm:$0xff]   ;;  %v2523_v59 = vld [vmem:[%s3490_s1 + $0x52c] ss:$16 sps:$4 sm:$0xff]  }
  0x6b   :  { %1693 = vmatpush1.bf16.msra.mxu0 %v2428_v60  ;;  %1857 = vmatpush1.bf16.msra.mxu1 %v2431_v61  ;;  %v2518_v60 = vld [vmem:[%s3490_s1 + $0x520] ss:$16 sps:$4 sm:$0xff]   ;;  %v2521_v61 = vld [vmem:[%s3490_s1 + $0x528] ss:$16 sps:$4 sm:$0xff]  }
  0x6c   :  { %1694 = vmatprep.subr.bf16.mxu0 %v2436_v62  ;;  %1858 = vmatprep.subr.bf16.mxu1 %v2439_v63  ;;  %v2526_v62 = vld [vmem:[%s3490_s1 + $0x544] ss:$16 sps:$4 sm:$0xff]   ;;  %v2529_v63 = vld [vmem:[%s3490_s1 + $0x54c] ss:$16 sps:$4 sm:$0xff]  }
  0x6f   :  { %1695 = vmatpush1.bf16.msra.mxu0 %v2434_v0  ;;  %1859 = vmatpush1.bf16.msra.mxu1 %v2437_v1  ;;  %v2524_v0 = vld [vmem:[%s3490_s1 + $0x540] ss:$16 sps:$4 sm:$0xff]   ;;  %v2527_v1 = vld [vmem:[%s3490_s1 + $0x548] ss:$16 sps:$4 sm:$0xff]  }
  0x70   :  { %1696 = vmatprep.subr.bf16.mxu0 %v2442_v2  ;;  %1860 = vmatprep.subr.bf16.mxu1 %v2445_v3  ;;  %v2532_v2 = vld [vmem:[%s3490_s1 + $0x564] ss:$16 sps:$4 sm:$0xff]   ;;  %v2535_v3 = vld [vmem:[%s3490_s1 + $0x56c] ss:$16 sps:$4 sm:$0xff]  }
  0x73   :  { %1697 = vmatpush1.bf16.msra.mxu0 %v2440_v4  ;;  %1861 = vmatpush1.bf16.msra.mxu1 %v2443_v5  ;;  %v2530_v4 = vld [vmem:[%s3490_s1 + $0x560] ss:$16 sps:$4 sm:$0xff]   ;;  %v2533_v5 = vld [vmem:[%s3490_s1 + $0x568] ss:$16 sps:$4 sm:$0xff]  }
  0x74   :  { %1698 = vmatprep.subr.bf16.mxu0 %v2448_v6  ;;  %1862 = vmatprep.subr.bf16.mxu1 %v2451_v7  ;;  %v2538_v6 = vld [vmem:[%s3490_s1 + $0x584] ss:$16 sps:$4 sm:$0xff]   ;;  %v2541_v7 = vld [vmem:[%s3490_s1 + $0x58c] ss:$16 sps:$4 sm:$0xff]  }
  0x77   :  { %1699 = vmatpush1.bf16.msra.mxu0 %v2446_v8  ;;  %1863 = vmatpush1.bf16.msra.mxu1 %v2449_v9  ;;  %v2536_v8 = vld [vmem:[%s3490_s1 + $0x580] ss:$16 sps:$4 sm:$0xff]   ;;  %v2539_v9 = vld [vmem:[%s3490_s1 + $0x588] ss:$16 sps:$4 sm:$0xff]  }
  0x78   :  { %1700 = vmatprep.subr.bf16.mxu0 %v2454_v10  ;;  %1864 = vmatprep.subr.bf16.mxu1 %v2457_v11  ;;  %v2544_v10 = vld [vmem:[%s3490_s1 + $0x5a4] ss:$16 sps:$4 sm:$0xff]   ;;  %v2547_v11 = vld [vmem:[%s3490_s1 + $0x5ac] ss:$16 sps:$4 sm:$0xff]  }
  0x7b   :  { %1701 = vmatpush1.bf16.msra.mxu0 %v2452_v12  ;;  %1865 = vmatpush1.bf16.msra.mxu1 %v2455_v13  ;;  %v2542_v12 = vld [vmem:[%s3490_s1 + $0x5a0] ss:$16 sps:$4 sm:$0xff]   ;;  %v2545_v13 = vld [vmem:[%s3490_s1 + $0x5a8] ss:$16 sps:$4 sm:$0xff]  }
  0x7c   :  { %1702 = vmatprep.subr.bf16.mxu0 %v2460_v14  ;;  %1866 = vmatprep.subr.bf16.mxu1 %v2463_v16  ;;  %v2550_v14 = vld [vmem:[%s3490_s1 + $0x5c4] ss:$16 sps:$4 sm:$0xff]   ;;  %v2553_v16 = vld [vmem:[%s3490_s1 + $0x5cc] ss:$16 sps:$4 sm:$0xff]  }
  0x7f   :  { %1703 = vmatpush1.bf16.msra.mxu0 %v2458_v17  ;;  %1867 = vmatpush1.bf16.msra.mxu1 %v2461_v18  ;;  %v2548_v17 = vld [vmem:[%s3490_s1 + $0x5c0] ss:$16 sps:$4 sm:$0xff]   ;;  %v2551_v18 = vld [vmem:[%s3490_s1 + $0x5c8] ss:$16 sps:$4 sm:$0xff]  }
  0x80   :  { %1713 = vmatprep.subr.bf16.mxu0 %v2466_v19  ;;  %1877 = vmatprep.subr.bf16.mxu1 %v2469_v22  ;;  %v2556_v19 = vld [vmem:[%s3490_s1 + $0x5e4] ss:$16 sps:$4 sm:$0xff]   ;;  %v2559_v22 = vld [vmem:[%s3490_s1 + $0x5ec] ss:$16 sps:$4 sm:$0xff]  }
  0x82   :  { %1705 = vmatmul.mubr.bf16.vlgmr.msra.gmra.mrb[0].mxu0 %v339_v24  ;;  %1869 = vmatmul.mubr.bf16.vlgmr.msra.gmra.mrb[0].mxu1 %v339_v24  ;;  %v2557_v24 = vld [vmem:[%s3490_s1 + $0x5e8] ss:$16 sps:$4 sm:$0xff]  }
  0x83   :  { %1714 = vmatpush1.bf16.msra.mxu0 %v2464_v23  ;;  %1878 = vmatpush1.bf16.msra.mxu1 %v2467_v25  ;;  %v2554_v23 = vld [vmem:[%s3490_s1 + $0x5e0] ss:$16 sps:$4 sm:$0xff]   ;;  %v2563_v25 = vld [vmem:[%s3490_s1 + $0x604] ss:$16 sps:$4 sm:$0xff]  }
  0x84   :  { %1715 = vmatprep.subr.bf16.mxu0 %v2472_v26  ;;  %1879 = vmatprep.subr.bf16.mxu1 %v2475_v27  ;;  %v2566_v26 = vld [vmem:[%s3490_s1 + $0x60c] ss:$16 sps:$4 sm:$0xff]   ;;  %v2561_v27 = vld [vmem:[%s3490_s1 + $0x600] ss:$16 sps:$4 sm:$0xff]  }
  0x85   :  { %1745 = vmatprep.mubr.bf16.mxu0 %v2904_v20  ;;  %1909 = vmatprep.mubr.bf16.mxu1 %v2904_v20 }
  0x87   :  { %1716 = vmatpush1.bf16.msra.mxu0 %v2470_v15  ;;  %1880 = vmatpush1.bf16.msra.mxu1 %v2473_v28  ;;  %v2564_v15 = vld [vmem:[%s3490_s1 + $0x608] ss:$16 sps:$4 sm:$0xff]   ;;  %v2569_v28 = vld [vmem:[%s3490_s1 + $0x624] ss:$16 sps:$4 sm:$0xff]  }
  0x88   :  { %1717 = vmatprep.subr.bf16.mxu0 %v2478_v29  ;;  %1881 = vmatprep.subr.bf16.mxu1 %v2481_v30  ;;  %v2572_v29 = vld [vmem:[%s3490_s1 + $0x62c] ss:$16 sps:$4 sm:$0xff]   ;;  %v342_v30 = vcombine.high %v2904_v20, %v2904_v20  ;;  %v2575_v20 = vld [vmem:[%s3490_s1 + $0x644] ss:$16 sps:$4 sm:$0xff]  }
  0x8b   :  { %1718 = vmatpush1.bf16.msra.mxu0 %v2476_v31  ;;  %1882 = vmatpush1.bf16.msra.mxu1 %v2479_v32  ;;  %v2567_v31 = vld [vmem:[%s3490_s1 + $0x620] ss:$16 sps:$4 sm:$0xff]   ;;  %v2570_v32 = vld [vmem:[%s3490_s1 + $0x628] ss:$16 sps:$4 sm:$0xff]  }
  0x8c   :  { %1719 = vmatprep.subr.bf16.mxu0 %v2484_v33  ;;  %1883 = vmatprep.subr.bf16.mxu1 %v2487_v34  ;;  %v2578_v33 = vld [vmem:[%s3490_s1 + $0x64c] ss:$16 sps:$4 sm:$0xff]   ;;  %v2573_v34 = vld [vmem:[%s3490_s1 + $0x640] ss:$16 sps:$4 sm:$0xff]  }
  0x8f   :  { %1720 = vmatpush1.bf16.msra.mxu0 %v2482_v35  ;;  %1884 = vmatpush1.bf16.msra.mxu1 %v2485_v36  ;;  %v2576_v35 = vld [vmem:[%s3490_s1 + $0x648] ss:$16 sps:$4 sm:$0xff]   ;;  %v2581_v36 = vld [vmem:[%s3490_s1 + $0x664] ss:$16 sps:$4 sm:$0xff]  }
  0x90   :  { %1721 = vmatprep.subr.bf16.mxu0 %v2490_v37  ;;  %1885 = vmatprep.subr.bf16.mxu1 %v2493_v38  ;;  %v2584_v37 = vld [vmem:[%s3490_s1 + $0x66c] ss:$16 sps:$4 sm:$0xff]   ;;  %v2579_v38 = vld [vmem:[%s3490_s1 + $0x660] ss:$16 sps:$4 sm:$0xff]  }
  0x93   :  { %1722 = vmatpush1.bf16.msra.mxu0 %v2488_v39  ;;  %1886 = vmatpush1.bf16.msra.mxu1 %v2491_v40  ;;  %v2582_v39 = vld [vmem:[%s3490_s1 + $0x668] ss:$16 sps:$4 sm:$0xff]   ;;  %v2587_v40 = vld [vmem:[%s3490_s1 + $0x684] ss:$16 sps:$4 sm:$0xff]  }
  0x94   :  { %1723 = vmatprep.subr.bf16.mxu0 %v2496_v41  ;;  %1887 = vmatprep.subr.bf16.mxu1 %v2499_v43  ;;  %v2590_v41 = vld [vmem:[%s3490_s1 + $0x68c] ss:$16 sps:$4 sm:$0xff]   ;;  %v2585_v43 = vld [vmem:[%s3490_s1 + $0x680] ss:$16 sps:$4 sm:$0xff]  }
  0x97   :  { %1724 = vmatpush1.bf16.msra.mxu0 %v2494_v44  ;;  %1888 = vmatpush1.bf16.msra.mxu1 %v2497_v45  ;;  %v2588_v44 = vld [vmem:[%s3490_s1 + $0x688] ss:$16 sps:$4 sm:$0xff]   ;;  %v2593_v45 = vld [vmem:[%s3490_s1 + $0x6a4] ss:$16 sps:$4 sm:$0xff]  }
  0x98   :  { %1725 = vmatprep.subr.bf16.mxu0 %v2502_v46  ;;  %1889 = vmatprep.subr.bf16.mxu1 %v2505_v47  ;;  %v2596_v46 = vld [vmem:[%s3490_s1 + $0x6ac] ss:$16 sps:$4 sm:$0xff]   ;;  %v2591_v47 = vld [vmem:[%s3490_s1 + $0x6a0] ss:$16 sps:$4 sm:$0xff]  }
  0x9b   :  { %1726 = vmatpush1.bf16.msra.mxu0 %v2500_v48  ;;  %1890 = vmatpush1.bf16.msra.mxu1 %v2503_v49  ;;  %v2594_v48 = vld [vmem:[%s3490_s1 + $0x6a8] ss:$16 sps:$4 sm:$0xff]   ;;  %v2599_v49 = vld [vmem:[%s3490_s1 + $0x6c4] ss:$16 sps:$4 sm:$0xff]  }
  0x9c   :  { %1727 = vmatprep.subr.bf16.mxu0 %v2508_v50  ;;  %1891 = vmatprep.subr.bf16.mxu1 %v2511_v51  ;;  %v2602_v50 = vld [vmem:[%s3490_s1 + $0x6cc] ss:$16 sps:$4 sm:$0xff]   ;;  %v2597_v51 = vld [vmem:[%s3490_s1 + $0x6c0] ss:$16 sps:$4 sm:$0xff]  }
  0x9f   :  { %1728 = vmatpush1.bf16.msra.mxu0 %v2506_v52  ;;  %1892 = vmatpush1.bf16.msra.mxu1 %v2509_v53  ;;  %v2600_v52 = vld [vmem:[%s3490_s1 + $0x6c8] ss:$16 sps:$4 sm:$0xff]   ;;  %v2605_v53 = vld [vmem:[%s3490_s1 + $0x6e4] ss:$16 sps:$4 sm:$0xff]  }
  0xa0   :  { %1729 = vmatprep.subr.bf16.mxu0 %v2514_v54  ;;  %1893 = vmatprep.subr.bf16.mxu1 %v2517_v55  ;;  %v2608_v54 = vld [vmem:[%s3490_s1 + $0x6ec] ss:$16 sps:$4 sm:$0xff]   ;;  %v2603_v55 = vld [vmem:[%s3490_s1 + $0x6e0] ss:$16 sps:$4 sm:$0xff]  }
  0xa3   :  { %1730 = vmatpush1.bf16.msra.mxu0 %v2512_v56  ;;  %1894 = vmatpush1.bf16.msra.mxu1 %v2515_v57  ;;  %v2606_v56 = vld [vmem:[%s3490_s1 + $0x6e8] ss:$16 sps:$4 sm:$0xff]   ;;  %v2611_v57 = vld [vmem:[%s3490_s1 + $0x704] ss:$16 sps:$4 sm:$0xff]  }
  0xa4   :  { %1731 = vmatprep.subr.bf16.mxu0 %v2520_v58  ;;  %1895 = vmatprep.subr.bf16.mxu1 %v2523_v59  ;;  %v2614_v58 = vld [vmem:[%s3490_s1 + $0x70c] ss:$16 sps:$4 sm:$0xff]   ;;  %v2609_v59 = vld [vmem:[%s3490_s1 + $0x700] ss:$16 sps:$4 sm:$0xff]  }
  0xa7   :  { %1732 = vmatpush1.bf16.msra.mxu0 %v2518_v60  ;;  %1896 = vmatpush1.bf16.msra.mxu1 %v2521_v61  ;;  %v2612_v60 = vld [vmem:[%s3490_s1 + $0x708] ss:$16 sps:$4 sm:$0xff]   ;;  %v2617_v61 = vld [vmem:[%s3490_s1 + $0x724] ss:$16 sps:$4 sm:$0xff]  }
  0xa8   :  { %1733 = vmatprep.subr.bf16.mxu0 %v2526_v62  ;;  %1897 = vmatprep.subr.bf16.mxu1 %v2529_v63  ;;  %v2620_v62 = vld [vmem:[%s3490_s1 + $0x72c] ss:$16 sps:$4 sm:$0xff]   ;;  %v2615_v63 = vld [vmem:[%s3490_s1 + $0x720] ss:$16 sps:$4 sm:$0xff]  }
  0xab   :  { %1734 = vmatpush1.bf16.msra.mxu0 %v2524_v0  ;;  %1898 = vmatpush1.bf16.msra.mxu1 %v2527_v1  ;;  %v2618_v0 = vld [vmem:[%s3490_s1 + $0x728] ss:$16 sps:$4 sm:$0xff]   ;;  %v2623_v1 = vld [vmem:[%s3490_s1 + $0x744] ss:$16 sps:$4 sm:$0xff]  }
  0xac   :  { %1735 = vmatprep.subr.bf16.mxu0 %v2532_v2  ;;  %1899 = vmatprep.subr.bf16.mxu1 %v2535_v3  ;;  %v2626_v2 = vld [vmem:[%s3490_s1 + $0x74c] ss:$16 sps:$4 sm:$0xff]   ;;  %v2621_v3 = vld [vmem:[%s3490_s1 + $0x740] ss:$16 sps:$4 sm:$0xff]  }
  0xaf   :  { %1736 = vmatpush1.bf16.msra.mxu0 %v2530_v4  ;;  %1900 = vmatpush1.bf16.msra.mxu1 %v2533_v5  ;;  %v2624_v4 = vld [vmem:[%s3490_s1 + $0x748] ss:$16 sps:$4 sm:$0xff]   ;;  %v2629_v5 = vld [vmem:[%s3490_s1 + $0x764] ss:$16 sps:$4 sm:$0xff]  }
  0xb0   :  { %1737 = vmatprep.subr.bf16.mxu0 %v2538_v6  ;;  %1901 = vmatprep.subr.bf16.mxu1 %v2541_v7  ;;  %v2632_v6 = vld [vmem:[%s3490_s1 + $0x76c] ss:$16 sps:$4 sm:$0xff]   ;;  %v2627_v7 = vld [vmem:[%s3490_s1 + $0x760] ss:$16 sps:$4 sm:$0xff]  }
  0xb3   :  { %1738 = vmatpush1.bf16.msra.mxu0 %v2536_v8  ;;  %1902 = vmatpush1.bf16.msra.mxu1 %v2539_v9  ;;  %v2630_v8 = vld [vmem:[%s3490_s1 + $0x768] ss:$16 sps:$4 sm:$0xff]   ;;  %v2635_v9 = vld [vmem:[%s3490_s1 + $0x784] ss:$16 sps:$4 sm:$0xff]  }
  0xb4   :  { %1739 = vmatprep.subr.bf16.mxu0 %v2544_v10  ;;  %1903 = vmatprep.subr.bf16.mxu1 %v2547_v11  ;;  %v2638_v10 = vld [vmem:[%s3490_s1 + $0x78c] ss:$16 sps:$4 sm:$0xff]   ;;  %v2633_v11 = vld [vmem:[%s3490_s1 + $0x780] ss:$16 sps:$4 sm:$0xff]  }
  0xb7   :  { %1740 = vmatpush1.bf16.msra.mxu0 %v2542_v12  ;;  %1904 = vmatpush1.bf16.msra.mxu1 %v2545_v13  ;;  %v2636_v12 = vld [vmem:[%s3490_s1 + $0x788] ss:$16 sps:$4 sm:$0xff]   ;;  %v2641_v13 = vld [vmem:[%s3490_s1 + $0x7a4] ss:$16 sps:$4 sm:$0xff]  }
  0xb8   :  { %1741 = vmatprep.subr.bf16.mxu0 %v2550_v14  ;;  %1905 = vmatprep.subr.bf16.mxu1 %v2553_v16  ;;  %v2644_v14 = vld [vmem:[%s3490_s1 + $0x7ac] ss:$16 sps:$4 sm:$0xff]   ;;  %v2639_v16 = vld [vmem:[%s3490_s1 + $0x7a0] ss:$16 sps:$4 sm:$0xff]  }
  0xbb   :  { %1742 = vmatpush1.bf16.msra.mxu0 %v2548_v17  ;;  %1906 = vmatpush1.bf16.msra.mxu1 %v2551_v18  ;;  %v2642_v17 = vld [vmem:[%s3490_s1 + $0x7a8] ss:$16 sps:$4 sm:$0xff]   ;;  %v2647_v18 = vld [vmem:[%s3490_s1 + $0x7c4] ss:$16 sps:$4 sm:$0xff]  }
  0xbc   :  { %1743 = vmatprep.subr.bf16.mxu0 %v2556_v19  ;;  %1907 = vmatprep.subr.bf16.mxu1 %v2559_v22  ;;  %v2650_v19 = vld [vmem:[%s3490_s1 + $0x7cc] ss:$16 sps:$4 sm:$0xff]   ;;  %v2645_v22 = vld [vmem:[%s3490_s1 + $0x7c0] ss:$16 sps:$4 sm:$0xff]  }
  0xbf   :  { %1744 = vmatpush1.bf16.msra.mxu0 %v2554_v23  ;;  %1908 = vmatpush1.bf16.msra.mxu1 %v2557_v24  ;;  %v2648_v23 = vld [vmem:[%s3490_s1 + $0x7c8] ss:$16 sps:$4 sm:$0xff]   ;;  %v2653_v24 = vld [vmem:[%s3490_s1 + $0x7e4] ss:$16 sps:$4 sm:$0xff]  }
  0xc0   :  { %1754 = vmatprep.subr.bf16.mxu0 %v2563_v25  ;;  %1918 = vmatprep.subr.bf16.mxu1 %v2566_v26  ;;  %v2656_v25 = vld [vmem:[%s3490_s1 + $0x7ec] ss:$16 sps:$4 sm:$0xff]   ;;  %v2651_v26 = vld [vmem:[%s3490_s1 + $0x7e0] ss:$16 sps:$4 sm:$0xff]  }
  0xc2   :  { %1746 = vmatmul.mubr.bf16.vlgmr.msra.gmra.mrb[0].mxu0 %v2907_v21  ;;  %1910 = vmatmul.mubr.bf16.vlgmr.msra.gmra.mrb[0].mxu1 %v2907_v21 }
  0xc3   :  { %1755 = vmatpush1.bf16.msra.mxu0 %v2561_v27  ;;  %1919 = vmatpush1.bf16.msra.mxu1 %v2564_v15  ;;  %v2654_v27 = vld [vmem:[%s3490_s1 + $0x7e8] ss:$16 sps:$4 sm:$0xff]   ;;  %v340_v15 = vcombine.high %v2907_v21, %v2907_v21 }
  0xc4   :  { %1756 = vmatprep.subr.bf16.mxu0 %v2569_v28  ;;  %1920 = vmatprep.subr.bf16.mxu1 %v2572_v29  ;;  %v275_v28 = vsub.s32 0, %v2796_v42  ;;  %v283_v29 = vsub.s32 2, %v2796_v42 }
  0xc5   :  { %1786 = vmatprep.mubr.bf16.mxu0 %v342_v30  ;;  %1950 = vmatprep.mubr.bf16.mxu1 %v342_v30  ;;  %v271_v30 = vld [vmem:[%s3492_s2] sm:$0xf] }
  0xc6   :  { %v284_v21 = vrot.slane %v271_v30, %v283_v29 }
  0xc7   :  { %1757 = vmatpush1.bf16.msra.mxu0 %v2567_v31  ;;  %1921 = vmatpush1.bf16.msra.mxu1 %v2570_v32  ;;  %v279_v31 = vsub.s32 1, %v2796_v42  ;;  %v2658_v32 = vmov 1983009808  }
  0xc8   :  { %1758 = vmatprep.subr.bf16.mxu0 %v2575_v20  ;;  %1922 = vmatprep.subr.bf16.mxu1 %v2578_v33  ;;  %v1966_v20 = vunpack.c.l.s4 %v2658_v32  ;;  %v287_v33 = vsub.s32 3, %v2796_v42 }
  0xcb   :  { %1759 = vmatpush1.bf16.msra.mxu0 %v2573_v34  ;;  %1923 = vmatpush1.bf16.msra.mxu1 %v2576_v35  ;;  %v276_v34 = vrot.slane %v271_v30, %v275_v28  ;;  %v280_v35 = vrot.slane %v271_v30, %v279_v31 }
  0xcc   :  { %1760 = vmatprep.subr.bf16.mxu0 %v2581_v36  ;;  %1924 = vmatprep.subr.bf16.mxu1 %v2584_v37  ;;  %v1967_v36 = vunpack.c.0.s8 %v1966_v20  ;;  %v288_v37 = vrot.slane %v271_v30, %v287_v33 }
  0xcf   :  { %1761 = vmatpush1.bf16.msra.mxu0 %v2579_v38  ;;  %1925 = vmatpush1.bf16.msra.mxu1 %v2582_v39 }
  0xd0   :  { %1762 = vmatprep.subr.bf16.mxu0 %v2587_v40  ;;  %1926 = vmatprep.subr.bf16.mxu1 %v2590_v41 }
  0xd3   :  { %1763 = vmatpush1.bf16.msra.mxu0 %v2585_v43  ;;  %1927 = vmatpush1.bf16.msra.mxu1 %v2588_v44 }
  0xd4   :  { %1764 = vmatprep.subr.bf16.mxu0 %v2593_v45  ;;  %1928 = vmatprep.subr.bf16.mxu1 %v2596_v46  ;;  %v1970_v46 = vsub.s32 %v1967_v36, %v2796_v42 }
  0xd7   :  { %1765 = vmatpush1.bf16.msra.mxu0 %v2591_v47  ;;  %1929 = vmatpush1.bf16.msra.mxu1 %v2594_v48 }
  0xd8   :  { %1766 = vmatprep.subr.bf16.mxu0 %v2599_v49  ;;  %1930 = vmatprep.subr.bf16.mxu1 %v2602_v50 }
  0xdb   :  { %1767 = vmatpush1.bf16.msra.mxu0 %v2597_v51  ;;  %1931 = vmatpush1.bf16.msra.mxu1 %v2600_v52 }
  0xdc   :  { %1768 = vmatprep.subr.bf16.mxu0 %v2605_v53  ;;  %1932 = vmatprep.subr.bf16.mxu1 %v2608_v54 }
  0xdf   :  { %1769 = vmatpush1.bf16.msra.mxu0 %v2603_v55  ;;  %1933 = vmatpush1.bf16.msra.mxu1 %v2606_v56 }
  0xe0   :  { %1770 = vmatprep.subr.bf16.mxu0 %v2611_v57  ;;  %1934 = vmatprep.subr.bf16.mxu1 %v2614_v58 }
  0xe3   :  { %1771 = vmatpush1.bf16.msra.mxu0 %v2609_v59  ;;  %1935 = vmatpush1.bf16.msra.mxu1 %v2612_v60 }
  0xe4   :  { %1772 = vmatprep.subr.bf16.mxu0 %v2617_v61  ;;  %1936 = vmatprep.subr.bf16.mxu1 %v2620_v62 }
  0xe7   :  { %1773 = vmatpush1.bf16.msra.mxu0 %v2615_v63  ;;  %1937 = vmatpush1.bf16.msra.mxu1 %v2618_v0 }
  0xe8   :  { %1774 = vmatprep.subr.bf16.mxu0 %v2623_v1  ;;  %1938 = vmatprep.subr.bf16.mxu1 %v2626_v2 }
  0xeb   :  { %1775 = vmatpush1.bf16.msra.mxu0 %v2621_v3  ;;  %1939 = vmatpush1.bf16.msra.mxu1 %v2624_v4 }
  0xec   :  { %1776 = vmatprep.subr.bf16.mxu0 %v2629_v5  ;;  %1940 = vmatprep.subr.bf16.mxu1 %v2632_v6 }
  0xef   :  { %1777 = vmatpush1.bf16.msra.mxu0 %v2627_v7  ;;  %1941 = vmatpush1.bf16.msra.mxu1 %v2630_v8 }
  0xf0   :  { %1778 = vmatprep.subr.bf16.mxu0 %v2635_v9  ;;  %1942 = vmatprep.subr.bf16.mxu1 %v2638_v10 }
  0xf3   :  { %1779 = vmatpush1.bf16.msra.mxu0 %v2633_v11  ;;  %1943 = vmatpush1.bf16.msra.mxu1 %v2636_v12 }
  0xf4   :  { %1780 = vmatprep.subr.bf16.mxu0 %v2641_v13  ;;  %1944 = vmatprep.subr.bf16.mxu1 %v2644_v14 }
  0xf7   :  { %1781 = vmatpush1.bf16.msra.mxu0 %v2639_v16  ;;  %1945 = vmatpush1.bf16.msra.mxu1 %v2642_v17 }
  0xf8   :  { %1782 = vmatprep.subr.bf16.mxu0 %v2647_v18  ;;  %1946 = vmatprep.subr.bf16.mxu1 %v2650_v19 }
  0xfb   :  { %1783 = vmatpush1.bf16.msra.mxu0 %v2645_v22  ;;  %1947 = vmatpush1.bf16.msra.mxu1 %v2648_v23 }
  0xfc   :  { %1784 = vmatprep.subr.bf16.mxu0 %v2653_v24  ;;  %1948 = vmatprep.subr.bf16.mxu1 %v2656_v25 }
  0xff   :  { %1785 = vmatpush1.bf16.msra.mxu0 %v2651_v26  ;;  %1949 = vmatpush1.bf16.msra.mxu1 %v2654_v27 }
 0x102   :  { %1787 = vmatmul.mubr.bf16.vlgmr.msra.gmra.mrb[0].mxu0 %v340_v15  ;;  %1951 = vmatmul.mubr.bf16.vlgmr.msra.gmra.mrb[0].mxu1 %v340_v15 }
 0x1d5   :  { %v1788_v38 = vpop.f32.mrb[0].mxu0  ;;  %v1952_v39 = vpop.f32.mrb[0].mxu1 }
 0x1d6   :  { %v2242_v40 = vadd.f32 %v1788_v38, %v276_v34  ;;  %v2244_v41 = vadd.f32 %v1952_v39, %v284_v21  ;;  %v1790_v43 = vpop.f32.mrb[1].mxu0  ;;  %v1954_v44 = vpop.f32.mrb[1].mxu1 }
 0x1d7   :  { %v2243_v45 = vadd.f32 %v1790_v43, %v280_v35  ;;  %v2245_v47 = vadd.f32 %v1954_v44, %v288_v37  ;;  %v1792_v48 = vpop.f32.mrb[2].mxu0  ;;  %v1956_v49 = vpop.f32.mrb[2].mxu1 }
 0x1d8   :  { %v1793_v50 = vpop.f32.mrb[3].mxu0  ;;  %v1957_v51 = vpop.f32.mrb[3].mxu1 }
 0x1d9   :  { %v1963_v52 = vcombine.low %v2242_v40, %v2243_v45  ;;  %v1964_v53 = vcombine.low %v2244_v41, %v2245_v47 }
 0x1db   :  { %v1971_v54 = vrot.slane %v1963_v52, %v1970_v46  ;;  %v1978_v55 = vrot.slane %v1964_v53, %v1970_v46 }
 0x1dd   :  { %v1979_v56 = vcombine.low %v1971_v54, %v1978_v55 }
 0x1df   :  { %1981 = vst [vmem:[%s3493_s3] sm:$0xff] %v1979_v56 }

</bundles_post_ra>
